<compile_context>
chip_gen: v5e
topology: v5e:2x2
jax: 0.10.0
libtpu: 0.0.40
codegen_flags: <defaults>
</compile_context>

<pallas_src>
import jax
import jax.numpy as jnp
from jax import lax
from jax.experimental import pallas as pl
from jax.experimental.pallas import tpu as pltpu

EPS = 1e-5
_VMEM_LIMIT = 48 * 1024 * 1024   # explicit scoped-VMEM budget, safe on v7x (64 MiB phys)


# ---------------------------------------------------------------------------
# Kernels. Each works on one batch tile of `block_n` full-length sequences.
# Internally everything is channels-last, flattened to (block_n*L, C) rows so
# every conv is one big (rows, Cin) x (Cin, Cout) MXU matmul with f32 accum.
# ---------------------------------------------------------------------------

def _store_stats(s_ref, z):
    """Per-tile BN batch stats [sum, sum_sq] over the tile rows, single store (f32)."""
    c = z.shape[-1]
    s0 = jnp.sum(z, axis=0, keepdims=True)          # (1, C) f32
    s1 = jnp.sum(z * z, axis=0, keepdims=True)      # (1, C) f32
    row = lax.broadcasted_iota(jnp.int32, (2, c), 0)
    s_ref[...] = jnp.where(row == 0, s0, s1).reshape(1, 2, c)


def conv1x1_stats_kernel(x_ref, w_ref, y_ref, s_ref):
    # x_ref: (nb, Cin, L) channels-first input tile (module's native layout)
    # w_ref: (Cin, width) compute dtype
    # y_ref: (nb, L, width) raw conv1 output (compute dtype)
    # s_ref: (1, 2, width) f32 per-tile [sum, sum_sq] for BN1 batch statistics
    nb, cin, l = x_ref.shape
    width = w_ref.shape[1]
    # in-kernel transpose (XLU) instead of a wrapper-side HBM round trip
    x = jnp.swapaxes(x_ref[...], 1, 2).reshape(nb * l, cin)
    y = jnp.dot(x.astype(w_ref.dtype), w_ref[...], preferred_element_type=jnp.float32)
    y_ref[...] = y.reshape(nb, l, width).astype(y_ref.dtype)
    _store_stats(s_ref, y)


def bn_relu_conv3_stats_kernel(y_ref, sc_ref, sh_ref, w_ref, z_ref, s_ref):
    # y_ref: (nb, L, C) raw conv1 output (compute dtype); sc/sh: (1, C) f32 folded BN1
    # w_ref: (3, C, C) conv2 taps [tap, cin, cout] (compute dtype)
    # z_ref: (nb, L, C) raw conv2 output (compute dtype); s_ref: (1, 2, C) f32 stats
    nb, l, c = y_ref.shape
    cout = w_ref.shape[2]
    m = nb * l
    cdt = w_ref.dtype

    # bn1 apply (single f32 fused multiply-add) + relu
    a = jnp.maximum(
        y_ref[...].reshape(m, c).astype(jnp.float32) * sc_ref[...] + sh_ref[...], 0.0)

    # +-1 shifted taps via sublane roll (XLU); rows that wrapped across a
    # sequence boundary (conv pad=1) are zeroed with a where mask.
    row = lax.broadcasted_iota(jnp.int32, (m, c), 0)
    a_prev = jnp.where(row % l == 0, 0.0, pltpu.roll(a, 1, 0))          # a[r-1]
    a_next = jnp.where(row % l == l - 1, 0.0, pltpu.roll(a, m - 1, 0))  # a[r+1]

    # out[l] = a[l-1] @ W0 + a[l] @ W1 + a[l+1] @ W2 ; accumulate into center tap.
    z = jnp.dot(a.astype(cdt), w_ref[1], preferred_element_type=jnp.float32)
    z = z + jnp.dot(a_prev.astype(cdt), w_ref[0], preferred_element_type=jnp.float32)
    z = z + jnp.dot(a_next.astype(cdt), w_ref[2], preferred_element_type=jnp.float32)

    z_ref[...] = z.reshape(nb, l, cout).astype(z_ref.dtype)
    _store_stats(s_ref, z)


def bn_relu_conv1x1_stats_kernel(y_ref, sc_ref, sh_ref, w_ref, z_ref, s_ref):
    # bn2 apply + relu fused with conv3 (1x1) + bn3 statistics.
    nb, l, c = y_ref.shape
    cout = w_ref.shape[1]
    a = jnp.maximum(
        y_ref[...].reshape(nb * l, c).astype(jnp.float32) * sc_ref[...] + sh_ref[...],
        0.0)
    z = jnp.dot(a.astype(w_ref.dtype), w_ref[...], preferred_element_type=jnp.float32)
    z_ref[...] = z.reshape(nb, l, cout).astype(z_ref.dtype)
    _store_stats(s_ref, z)


def bn_residual_relu_kernel(z_ref, x_ref, sc_ref, sh_ref, o_ref):
    # bn3 apply + residual add (identity = original x) + relu.
    # z_ref: (nb, L, Cout) raw conv3 output (compute dtype)
    # x_ref: (nb, Cout, L) identity in the module's native channels-first layout
    # o_ref: (nb, Cout, L) written channels-first directly (no wrapper transpose)
    nb, l, c = z_ref.shape
    z = z_ref[...].reshape(nb * l, c).astype(jnp.float32)
    z = z * sc_ref[...] + sh_ref[...]                       # bn3 apply, f32 FMA
    z = jnp.swapaxes(z.reshape(nb, l, c), 1, 2)             # (nb, Cout, L) via XLU
    o_ref[...] = jnp.maximum(z + x_ref[...].astype(jnp.float32), 0.0).astype(o_ref.dtype)


# ---------------------------------------------------------------------------
# Wrapper
# ---------------------------------------------------------------------------

def _fold_bn(stats, gamma, beta, count):
    """Fold training-mode BN (batch stats, biased var) into per-channel scale/shift."""
    s = jnp.sum(stats, axis=0)                 # (2, C): [sum, sum_sq] over all tiles
    mean = s[0] / count
    var = s[1] / count - mean * mean           # one-pass variance, f32 accumulation
    scale = gamma * lax.rsqrt(var + EPS)
    shift = beta - mean * scale
    return scale.reshape(1, -1), shift.reshape(1, -1)


def _pick_block_n(n, l, cout, target_rows=4096, vmem_budget=40 << 20):
    """Largest batch-tile that keeps ~1k-4k MXU rows, fits VMEM (v7x-safe) and
    still leaves enough grid steps for megacore sharding / pipelining."""
    bytes_per_row = cout * 4 * 3 * 2           # fattest stage (4): x + out + z, x2 bufs
    rows_cap = max(l, vmem_budget // bytes_per_row)
    target = max(l, min(target_rows, rows_cap))
    divisors = [d for d in range(1, n + 1) if n % d == 0]
    feasible = [d for d in divisors if d * l <= target] or [1]
    for min_steps in (8, 2, 1):                # prefer >= 8 steps (2 TCs + pipeline)
        good = [d for d in feasible if n // d >= min_steps]
        if good:
            return max(good)
    return 1


def bottleneck1d(x_ncl, params, *, dtype=jnp.bfloat16, block_n=None):
    """Bottleneck1d forward. x_ncl: (N, C, L) like PyTorch.

    stride=1, downsample=None path (requires in_planes == planes * expansion).
    `dtype` is the compute/intermediate dtype fed to the MXU (bf16 by default);
    BN statistics, BN apply and the residual path stay in f32.
    """
    w1, g1, b1, w2, g2, b2, w3, g3, b3 = params
    n, cin, L = x_ncl.shape
    width = w1.shape[0]
    cout = w3.shape[0]
    assert cin == cout, "downsample=None path requires in_planes == planes * expansion"
    if block_n is None:
        block_n = _pick_block_n(n, L, cout)
    assert n % block_n == 0
    steps = n // block_n
    grid = (steps,)
    count = jnp.float32(n * L)

    # Weights: cast ONCE in the wrapper to the MXU compute dtype.
    w1m = jnp.transpose(w1[:, :, 0], (1, 0)).astype(dtype)   # (Cin, width)
    w2m = jnp.transpose(w2, (2, 1, 0)).astype(dtype)         # (3, width, width) [tap,ci,co]
    w3m = jnp.transpose(w3[:, :, 0], (1, 0)).astype(dtype)   # (width, Cout)

    cp = pltpu.CompilerParams(dimension_semantics=("parallel",),
                              vmem_limit_bytes=_VMEM_LIMIT)

    def tile_nlc(c):      # channels-last activation tiles
        return pl.BlockSpec((block_n, L, c), lambda i: (i, 0, 0))

    def tile_ncl(c):      # channels-first (native) input / output tiles
        return pl.BlockSpec((block_n, c, L), lambda i: (i, 0, 0))

    def full_spec(shape):
        zeros = (0,) * len(shape)
        return pl.BlockSpec(shape, lambda i, z=zeros: z)

    def stats_spec(c):
        return pl.BlockSpec((1, 2, c), lambda i: (i, 0, 0))

    def stats_shape(c):
        return jax.ShapeDtypeStruct((steps, 2, c), jnp.float32)

    # ---- stage 1: conv1 (1x1, reads native NCL) + bn1 batch statistics ----
    y1, st1 = pl.pallas_call(
        conv1x1_stats_kernel,
        grid=grid,
        in_specs=[tile_ncl(cin), full_spec((cin, width))],
        out_specs=(tile_nlc(width), stats_spec(width)),
        out_shape=(jax.ShapeDtypeStruct((n, L, width), dtype), stats_shape(width)),
        compiler_params=cp,
    )(x_ncl, w1m)
    sc1, sh1 = _fold_bn(st1, g1, b1, count)

    # ---- stage 2: bn1-apply + relu + conv2 (k=3, pad=1) + bn2 statistics ----
    y2, st2 = pl.pallas_call(
        bn_relu_conv3_stats_kernel,
        grid=grid,
        in_specs=[tile_nlc(width), full_spec((1, width)), full_spec((1, width)),
                  full_spec((3, width, width))],
        out_specs=(tile_nlc(width), stats_spec(width)),
        out_shape=(jax.ShapeDtypeStruct((n, L, width), dtype), stats_shape(width)),
        compiler_params=cp,
    )(y1, sc1, sh1, w2m)
    sc2, sh2 = _fold_bn(st2, g2, b2, count)

    # ---- stage 3: bn2-apply + relu + conv3 (1x1) + bn3 statistics ----
    y3, st3 = pl.pallas_call(
        bn_relu_conv1x1_stats_kernel,
        grid=grid,
        in_specs=[tile_nlc(width), full_spec((1, width)), full_spec((1, width)),
                  full_spec((width, cout))],
        out_specs=(tile_nlc(cout), stats_spec(cout)),
        out_shape=(jax.ShapeDtypeStruct((n, L, cout), dtype), stats_shape(cout)),
        compiler_params=cp,
    )(y2, sc2, sh2, w3m)
    sc3, sh3 = _fold_bn(st3, g3, b3, count)

    # ---- stage 4: bn3-apply + residual add + relu, written channels-first ----
    # TODO(synk): pipeline_mode=pl.Buffered(3) on these in_specs and an
    #             input_output_alias (y3 -> out) once dtypes match would further
    #             hide HBM latency in this pure-bandwidth stage.
    out = pl.pallas_call(
        bn_residual_relu_kernel,
        grid=grid,
        in_specs=[tile_nlc(cout), tile_ncl(cout),
                  full_spec((1, cout)), full_spec((1, cout))],
        out_specs=tile_ncl(cout),
        out_shape=jax.ShapeDtypeStruct((n, cout, L), x_ncl.dtype),
        compiler_params=cp,
    )(y3, x_ncl, sc3, sh3)

    return out                                               # (N, C, L), no wrapper transpose


# ---------------------------------------------------------------------------
# Pure-JAX reference matching the PyTorch forward (training-mode BN)
# ---------------------------------------------------------------------------

def reference(x_ncl, params):
    w1, g1, b1, w2, g2, b2, w3, g3, b3 = params

    def conv(x, w, pad):
        return lax.conv_general_dilated(
            x, w, window_strides=(1,), padding=((pad, pad),),
            dimension_numbers=('NCH', 'OIH', 'NCH'))

    def bn(x, g, b):
        m = jnp.mean(x, axis=(0, 2), keepdims=True)
        v = jnp.mean((x - m) ** 2, axis=(0, 2), keepdims=True)
        return (x - m) * lax.rsqrt(v + EPS) * g.reshape(1, -1, 1) + b.reshape(1, -1, 1)

    y = jnp.maximum(bn(conv(x_ncl, w1, 0), g1, b1), 0.0)
    y = jnp.maximum(bn(conv(y, w2, 1), g2, b2), 0.0)
    z = bn(conv(y, w3, 0), g3, b3)
    return jnp.maximum(z + x_ncl, 0.0)


if __name__ == "__main__":
    # Small shapes: batch=4, planes=32 -> width=32, out = planes*4 = 128 = in_planes,
    # L=128 (stride=1, downsample=None). 128 channels / 128-long sequences keep the
    # in/out tiles lane-dense and the in-kernel transposes square and aligned.
    N, planes, L = 4, 32, 128
    width = planes           # base_width=64, groups=1
    Cout = planes * 4        # expansion = 4
    Cin = Cout               # identity residual path

    key = jax.random.PRNGKey(0)
    ks = jax.random.split(key, 10)
    x = jax.random.normal(ks[0], (N, Cin, L), jnp.float32)
    w1 = jax.random.normal(ks[1], (width, Cin, 1), jnp.float32) * 0.1   # conv1.weight
    w2 = jax.random.normal(ks[2], (width, width, 3), jnp.float32) * 0.1 # conv2.weight
    w3 = jax.random.normal(ks[3], (Cout, width, 1), jnp.float32) * 0.1  # conv3.weight
    g1 = 1.0 + 0.1 * jax.random.normal(ks[4], (width,), jnp.float32)
    b1 = 0.1 * jax.random.normal(ks[5], (width,), jnp.float32)
    g2 = 1.0 + 0.1 * jax.random.normal(ks[6], (width,), jnp.float32)
    b2 = 0.1 * jax.random.normal(ks[7], (width,), jnp.float32)
    g3 = 1.0 + 0.1 * jax.random.normal(ks[8], (Cout,), jnp.float32)
    b3 = 0.1 * jax.random.normal(ks[9], (Cout,), jnp.float32)
    params = (w1, g1, b1, w2, g2, b2, w3, g3, b3)

    ref = jax.block_until_ready(reference(x, params))

    # f32 compute path: strict numerical check of the kernel structure.
    out32 = jax.block_until_ready(bottleneck1d(x, params, dtype=jnp.float32))
    assert out32.shape == (N, Cout, L)
    err32 = float(jnp.max(jnp.abs(out32 - ref)))
    assert jnp.allclose(out32, ref, atol=2e-4, rtol=2e-4), err32

    # default bf16 compute path: loose tolerance (bf16 intermediates / MXU operands).
    out16 = jax.block_until_ready(bottleneck1d(x, params))
    err16 = float(jnp.max(jnp.abs(out16.astype(jnp.float32) - ref)))
    assert err16 < 2e-1, err16

    print("KERNEL_OK")
</pallas_src>

<mosaic_0001>
module attributes {stable_mosaic.version = 11 : i64} {
  func.func @conv1x1_stats_kernel(%arg0: i32, %arg1: memref<2x128x128xf32, #tpu.memory_space<vmem>>, %arg2: memref<128x32xf32, #tpu.memory_space<vmem>>, %arg3: memref<2x128x32xf32, #tpu.memory_space<vmem>>, %arg4: memref<1x2x32xf32, #tpu.memory_space<vmem>>) attributes {dimension_semantics = [#tpu.dimension_semantics<parallel>], iteration_bounds = array<i64: 2>, scalar_prefetch = 0 : i64, scratch_operands = 0 : i64, tpu.core_type = #tpu.core_type<tc>, window_params = [{transform_indices = @transform_0, window_bounds = array<i64: 2, 128, 128>}, {pipeline_mode = #tpu.pipeline_mode<synchronous>, transform_indices = @transform_1, window_bounds = array<i64: 128, 32>}, {transform_indices = @transform_2, window_bounds = array<i64: 2, 128, 32>}, {transform_indices = @transform_3, window_bounds = array<i64: 1, 2, 32>}]} {
    %c0 = arith.constant 0 : index
    %c0_0 = arith.constant 0 : index
    %c0_1 = arith.constant 0 : index
    %0 = vector.load %arg1[%c0, %c0_0, %c0_1] : memref<2x128x128xf32, #tpu.memory_space<vmem>>, vector<2x128x128xf32>
    %1 = tpu.transpose %0, [0, 2, 1] : vector<2x128x128xf32> -> vector<2x128x128xf32>
    %2 = vector.shape_cast %1 : vector<2x128x128xf32> to vector<256x128xf32>
    %c0_2 = arith.constant 0 : index
    %c0_3 = arith.constant 0 : index
    %3 = vector.load %arg2[%c0_2, %c0_3] : memref<128x32xf32, #tpu.memory_space<vmem>>, vector<128x32xf32>
    %cst = arith.constant dense<0.000000e+00> : vector<256x32xf32>
    %4 = tpu.matmul %2, %3, %cst {dimension_numbers = #tpu.dot_dimension_numbers<[1], [0], [0], [1], [0, 0, 1, 1], [], []>} : vector<256x128xf32>, vector<128x32xf32>, vector<256x32xf32> -> vector<256x32xf32>
    %5 = vector.shape_cast %4 : vector<256x32xf32> to vector<2x128x32xf32>
    %c0_4 = arith.constant 0 : index
    %c0_5 = arith.constant 0 : index
    %c0_6 = arith.constant 0 : index
    %6 = vector.load %arg3[%c0_4, %c0_5, %c0_6] : memref<2x128x32xf32, #tpu.memory_space<vmem>>, vector<2x128x32xf32>
    tpu.vector_store %arg3[%c0_4, %c0_5, %c0_6], %5 {strides = array<i32>} : memref<2x128x32xf32, #tpu.memory_space<vmem>>, vector<2x128x32xf32>,
    %cst_7 = arith.constant dense<0.000000e+00> : vector<32xf32>
    %7 = vector.multi_reduction <add>, %4, %cst_7 [0] : vector<256x32xf32> to vector<32xf32>
    %8 = vector.shape_cast %7 : vector<32xf32> to vector<1x32xf32>
    %9 = arith.mulf %4, %4 : vector<256x32xf32>
    %cst_8 = arith.constant dense<0.000000e+00> : vector<32xf32>
    %10 = vector.multi_reduction <add>, %9, %cst_8 [0] : vector<256x32xf32> to vector<32xf32>
    %11 = vector.shape_cast %10 : vector<32xf32> to vector<1x32xf32>
    %12 = tpu.iota {dimensions = array<i32: 0>} : vector<2x32xi32>
    %c0_i32 = arith.constant 0 : i32
    %13 = vector.broadcast %c0_i32 : i32 to vector<2x32xi32>
    %14 = arith.cmpi eq, %12, %13 : vector<2x32xi32>
    %15 = vector.shape_cast %8 : vector<1x32xf32> to vector<1x32xf32>
    %16 = vector.broadcast %15 : vector<1x32xf32> to vector<2x32xf32>
    %17 = vector.shape_cast %11 : vector<1x32xf32> to vector<1x32xf32>
    %18 = vector.broadcast %17 : vector<1x32xf32> to vector<2x32xf32>
    %19 = arith.select %14, %16, %18 : vector<2x32xi1>, vector<2x32xf32>
    %20 = vector.shape_cast %19 : vector<2x32xf32> to vector<1x2x32xf32>
    %c0_9 = arith.constant 0 : index
    %c0_10 = arith.constant 0 : index
    %c0_11 = arith.constant 0 : index
    %21 = vector.load %arg4[%c0_9, %c0_10, %c0_11] : memref<1x2x32xf32, #tpu.memory_space<vmem>>, vector<1x2x32xf32>
    tpu.vector_store %arg4[%c0_9, %c0_10, %c0_11], %20 {strides = array<i32>} : memref<1x2x32xf32, #tpu.memory_space<vmem>>, vector<1x2x32xf32>,
    return
  }
  func.func @transform_0(%arg0: i32) -> (i32, i32, i32) {
    %c0_i32 = arith.constant 0 : i32
    %c0_i32_0 = arith.constant 0 : i32
    %c0_i32_1 = arith.constant 0 : i32
    return %arg0, %c0_i32, %c0_i32_0 : i32, i32, i32
  }
  func.func @transform_1(%arg0: i32) -> (i32, i32) {
    %c0_i32 = arith.constant 0 : i32
    %c0_i32_0 = arith.constant 0 : i32
    %c0_i32_1 = arith.constant 0 : i32
    return %c0_i32, %c0_i32_0 : i32, i32
  }
  func.func @transform_2(%arg0: i32) -> (i32, i32, i32) {
    %c0_i32 = arith.constant 0 : i32
    %c0_i32_0 = arith.constant 0 : i32
    %c0_i32_1 = arith.constant 0 : i32
    return %arg0, %c0_i32, %c0_i32_0 : i32, i32, i32
  }
  func.func @transform_3(%arg0: i32) -> (i32, i32, i32) {
    %c0_i32 = arith.constant 0 : i32
    %c0_i32_0 = arith.constant 0 : i32
    %c0_i32_1 = arith.constant 0 : i32
    return %arg0, %c0_i32, %c0_i32_0 : i32, i32, i32
  }
}

</mosaic_0001>

<bundles_post_ra>
// kernel: tpu_custom_call.1
= control target key start
LH: loop header
LB: loop body
LE: loop exit
PB: predicated region body
PF: predicated region fallthrough
CT: control target
= control target key end

     0   :  { %9 = vsyncpa [#allocation3], 0  ;;  %s1557_s0 = inlined_call_operand.hbm [shape: f32[4,128,128], index: 0, kind: input, shape index: {}]   ;;  %s1558_s1 = inlined_call_operand.vmem [shape: f32[128,32], index: 1, kind: input, shape index: {}]   ;;  %s1559_s2 = inlined_call_operand.vmem [shape: f32[4,128,32], index: 2, kind: output, shape index: {0}]   ;;  %s1560_s3 = inlined_call_operand.hbm [shape: f32[2,2,32], index: 3, kind: output, shape index: {1}]  }
   0x1   :  { %11 = vsyncpa [#allocation3 + $0x1], 0 }
   0x2   :  { %12 = vsyncpa [#allocation4], 0 }
   0x3   :  { %14 = vsyncpa [#allocation4 + $0x1], 0  ;;  %s1113_s12 = smov 0   ;;  %s1115_s13 = smov 0  }
   0x4   :  { %s1117_s14 = smov 0   ;;  %s1119_s15 = smov 0  }
   0x5 LB: > { %s1134_s16 = sadd.s32 4294967295, %s1089_s15   ;;  %s765_s17 = sadd.s32 4294967294, %s1089_s15   ;;  %s1089_s15 = sphi %s1119_s15, %s1570_s15   ;;  %s1085_s14 = sphi %s1117_s14, %s1569_s14   ;;  %s1081_s13 = sphi %s1115_s13, %s1568_s13   ;;  %s1077_s12 = sphi %s1113_s12, %s1567_s12  }
   0x6   : > { %s1138_s18 = sadd.s32 1, %s1089_s15   ;;  %s27_s19 = sadd.s32 1, %s1085_s14 }
   0x7   : > { %s24_s20 = ssub.s32 %s1089_s15, %s1138_s18  ;;  %p34_p0 = scmp.ne.s32.totalorder %s1085_s14, %s1081_s13 }
   0x8   : > { %p25_p1 = scmp.eq.s32.totalorder %s24_s20, 0  ;;  %p35_p2 = scmp.eq.s32.totalorder %s1089_s15, 0 }
   0x9   : > { %p40_p3 = scmp.ne.s32.totalorder %s1081_s13, %s1077_s12  ;;  %p41_p4 = scmp.eq.s32.totalorder %s1134_s16, 0 }
   0xa   : > { %s1150_s21 = scalar_select %p25_p1, %s1085_s14, %s27_s19  }
   0xb   : > { %p1152_p5 = por %p35_p2, %p34_p0  ;;  %p1156_p6 = por %p41_p4, %p40_p3 }
   0xc   : > { %p111_p7 = scmp.eq.s32.totalorder %s1134_s16, 1  ;;  %p117_p8 = scmp.eq.s32.totalorder %s765_s17, 1 }
   0xd   : > { %p845_p10 = scmp.lt.s32.totalorder %s1089_s15, 2  ;;  %s140_s26 = sand.u32 1, %s1085_s14  }
   0xe   : > { %p1163_p11 = por %p111_p7, %p34_p0  ;;  %p1167_p12 = por %p117_p8, %p40_p3 }
   0xf   : > { %s783_s27 = sshll.u32 %s1089_s15, 8  ;;  %s768_s28 = sshll.u32 %s140_s26, 8 }
  0x10   : > { %s150_s4 = scalar_lea.hbm %s1557_s0, %s783_s27  ;;  %s144_s6 = scalar_lea.vmem [#allocation2], %s768_s28 }
  0x11   : > { %s151_s5 = sshll.u32 %s150_s4, 4  ;;  %s153_s7 = sshll.u32 %s144_s6, 4  ;;  %s152_s5 = int_to_ptr.hbm [resolvable:$true] %s151_s5  ;;  %s154_s7 = int_to_ptr.vmem [resolvable:$true] %s153_s7 }
  0x12   : > { %p1178_p13 = pnand %p845_p10, %p1152_p5  ;;  %p772_p0 = scmp.ge.s32.totalorder %s1089_s15, 1 }
  0x13   : > { %p161_p1 = scmp.lt.s32.totalorder %s1089_s15, 3  ;;  %s141_s9 = scalar_lea.sflag [#allocation3], %s140_s26 }
  0x14   : > { %s993_s10 = sshra.s32 %s152_s5, 4  ;;  %p997_p3 = pneg %p1178_p13  ;;  %s994_s10 = int_to_ptr.hbm [resolvable:$true] %s993_s10 }
  0x15   : > { %s995_s11 = scalar_lea.hbm %s994_s10, 256  ;;  %s1000_s20 = scalar_lea.hbm %s1557_s0, 512 }
  0x16   : > { %p996_p2 = scmp.ne.s32.totalorder %s994_s10, %s995_s11  ;;  %p1001_p5 = scmp.lt.s32.totalorder %s994_s10, %s1557_s0 }
  0x17   : > { %p1002_p8 = scmp.lt.s32.totalorder %s1000_s20, %s995_s11 }
  0x18   : > { %p998_p4 = pnand %p997_p3, %p996_p2 }
  0x19   : > { %p1003_p10 = por %p1002_p8, %p1001_p5 }
  0x1a   : > { %p999_p7 = pneg %p998_p4 }
  0x1c   : > { %p1004_p9 = pnand %p1003_p10, %p999_p7 }
  0x1e   : > { %1007 = shalt.err (!%p1004_p9)
}
  0x1f   : > { %s1091_s26 = smov 128   ;;  %s1092_s28 = smov 8  }
  0x20   : > { %840 = dma.hbm_to_vmem [thread:$0]  (!%p1178_p13), %s152_s5, 4096, %s154_s7, %s141_s9, %s1091_s26, %s1091_s26, %s1092_s28  }
  0x21   : > { %p162_p2 = pnand %p772_p0, %p161_p1 }
  0x22   : > { %s1199_s29 = sand.u32 (!%p162_p2), 1, %s1081_s13  }
  0x23   : > { %165 = sbr.rel (%p162_p2) target bundleno = 511 (0x1ff), region = 28  ;;  %s773_s30 = sshll.u32 (!%p162_p2), %s1199_s29, 8 }
  0x24   : > { %s168_s4 = scalar_lea.sflag (!%p162_p2), [#allocation3], %s1199_s29  ;;  %s1203_s6 = scalar_lea.vmem (!%p162_p2), [#allocation2], %s773_s30 }
  0x28   : > { %1068 = dma.done.wait (%p1156_p6), %s168_s4, 4096  }
  0x29   : > { %1070 = vsyncadd (%p1156_p6), %s168_s4, 4294963200  ;;  %v209_v0 = vld [vmem:[%s1203_s6] sm:$0xff]  ;;  %v210_v3 = vld [vmem:[%s1203_s6 + $0x8] sm:$0xff]  ;;  %s1290_s4 = sshll.u32 %s1134_s16, 1  ;;  %vm434_vm0 = vcmask 261120   ;;  %s774_s16 = sshll.u32 %s1199_s29, 1 }
  0x2a   : > { %v225_v1 = vld [vmem:[%s1203_s6 + $0x80] sm:$0xff]  ;;  %v226_v4 = vld [vmem:[%s1203_s6 + $0x88] sm:$0xff]  ;;  %v211_v6 = vld [vmem:[%s1203_s6 + $0x10] sm:$0xff]  ;;  %p203_p6 = scmp.lt.s32.totalorder %s1290_s4, 3  ;;  %s664_s17 = scalar_lea.hbm %s1560_s3, %s1290_s4  ;;  %vm641_vm2 = vcmask 254976  }
  0x2b   : > { %v881_v2 = vpack.i.bf16 %v225_v1, %v209_v0  ;;  %v883_v5 = vpack.i.bf16 %v226_v4, %v210_v3  ;;  %v227_v7 = vld [vmem:[%s1203_s6 + $0x90] sm:$0xff]  ;;  %v212_v9 = vld [vmem:[%s1203_s6 + $0x18] sm:$0xff]  ;;  %v213_v12 = vld [vmem:[%s1203_s6 + $0x20] sm:$0xff]  ;;  %s200_s19 = scalar_lea.vmem [#allocation5], %s774_s16  ;;  %s668_s22 = sshll.u32 %s664_s17, 4  ;;  %s669_s22 = int_to_ptr.hbm [resolvable:$true] %s668_s22 }
  0x2c   : > { %v885_v8 = vpack.i.bf16 %v227_v7, %v211_v6  ;;  %v228_v10 = vld [vmem:[%s1203_s6 + $0x98] sm:$0xff]  ;;  %v229_v13 = vld [vmem:[%s1203_s6 + $0xa0] sm:$0xff]  ;;  %v214_v15 = vld [vmem:[%s1203_s6 + $0x28] sm:$0xff]  ;;  %s204_s23 = scalar_select %p203_p6, %s1290_s4, 3 }
  0x2d   : > { %882 = vxpose.xlu0.b32.start [1/16] %v881_v2, 128  ;;  %v887_v11 = vpack.i.bf16 %v228_v10, %v212_v9  ;;  %v889_v14 = vpack.i.bf16 %v229_v13, %v213_v12  ;;  %v230_v16 = vld [vmem:[%s1203_s6 + $0xa8] sm:$0xff]  ;;  %v215_v18 = vld [vmem:[%s1203_s6 + $0x30] sm:$0xff]  ;;  %v216_v21 = vld [vmem:[%s1203_s6 + $0x38] sm:$0xff]  ;;  %s666_s20 = sshll.u32 %s200_s19, 4  ;;  %s650_s27 = scalar_lea.sflag [#allocation4], %s1199_s29  ;;  %s667_s20 = int_to_ptr.vmem [resolvable:$true] %s666_s20 }
  0x2e   : > { %v891_v17 = vpack.i.bf16 %v230_v16, %v214_v15  ;;  %v231_v19 = vld [vmem:[%s1203_s6 + $0xb0] sm:$0xff]  ;;  %v232_v22 = vld [vmem:[%s1203_s6 + $0xb8] sm:$0xff]  ;;  %v217_v24 = vld [vmem:[%s1203_s6 + $0x40] sm:$0xff]  ;;  %s784_s5 = sshll.u32 %s204_s23, 7  ;;  %s1037_s26 = sshra.s32 %s669_s22, 4  ;;  %s1038_s26 = int_to_ptr.hbm [resolvable:$true] %s1037_s26 }
  0x2f   : > { %v893_v20 = vpack.i.bf16 %v231_v19, %v215_v18  ;;  %v895_v23 = vpack.i.bf16 %v232_v22, %v216_v21  ;;  %v233_v25 = vld [vmem:[%s1203_s6 + $0xc0] sm:$0xff]  ;;  %v218_v27 = vld [vmem:[%s1203_s6 + $0x48] sm:$0xff]  ;;  %v219_v30 = vld [vmem:[%s1203_s6 + $0x50] sm:$0xff]  ;;  %s1297_s9 = scalar_lea.vmem %s1559_s2, %s784_s5  ;;  %s1039_s28 = scalar_lea.hbm %s1038_s26, 2 }
  0x30   : > { %v897_v26 = vpack.i.bf16 %v233_v25, %v217_v24  ;;  %v234_v28 = vld [vmem:[%s1203_s6 + $0xc8] sm:$0xff]  ;;  %v235_v31 = vld [vmem:[%s1203_s6 + $0xd0] sm:$0xff]  ;;  %v220_v33 = vld [vmem:[%s1203_s6 + $0x58] sm:$0xff]  ;;  %p1040_p9 = scmp.ne.s32.totalorder %s1038_s26, %s1039_s28  ;;  %s1043_s4 = scalar_lea.hbm %s1560_s3, 4 }
  0x31   : > { %v899_v29 = vpack.i.bf16 %v234_v28, %v218_v27  ;;  %v901_v32 = vpack.i.bf16 %v235_v31, %v219_v30  ;;  %v236_v34 = vld [vmem:[%s1203_s6 + $0xd8] sm:$0xff]  ;;  %v319_v37 = vld [vmem:[%s1558_s1 + $0x70] sm:$0xff]  ;;  %v221_v38 = vld [vmem:[%s1203_s6 + $0x60] sm:$0xff]  ;;  %p1044_p1 = scmp.lt.s32.totalorder %s1038_s26, %s1560_s3  ;;  %p1045_p3 = scmp.lt.s32.totalorder %s1043_s4, %s1039_s28 }
  0x32   : > { %v903_v35 = vpack.i.bf16 %v236_v34, %v220_v33  ;;  %v320_v36 = vld [vmem:[%s1558_s1 + $0x78] sm:$0xff]  ;;  %v237_v39 = vld [vmem:[%s1203_s6 + $0xe0] sm:$0xff]  ;;  %v318_v40 = vld [vmem:[%s1558_s1 + $0x68] sm:$0xff]  ;;  %p1041_p13 = pnand %p1040_p9, %p1163_p11 }
  0x33   : > { %321 = vmatpush.msra.mxu0 %v320_v36  ;;  %786 = vmatpush.msra.mxu2 %v320_v36  ;;  %v905_v41 = vpack.i.bf16 %v237_v39, %v221_v38  ;;  %v317_v42 = vld [vmem:[%s1558_s1 + $0x60] sm:$0xff]  ;;  %v316_v43 = vld [vmem:[%s1558_s1 + $0x58] sm:$0xff]  ;;  %v315_v44 = vld [vmem:[%s1558_s1 + $0x50] sm:$0xff]  ;;  %p1046_p4 = por %p1045_p3, %p1044_p1 }
  0x34   : > { %785 = vmatpush.msra.mxu1 %v320_v36  ;;  %787 = vmatpush.msra.mxu3 %v320_v36  ;;  %v222_v45 = vld [vmem:[%s1203_s6 + $0x68] sm:$0xff]  ;;  %v313_v49 = vld [vmem:[%s1558_s1 + $0x40] sm:$0xff]  ;;  %v312_v50 = vld [vmem:[%s1558_s1 + $0x38] sm:$0xff]  ;;  %p1042_p0 = pneg %p1041_p13 }
  0x35   : > { %884 = vxpose.xlu0.b32.cont [2/16] %v883_v5, 128  ;;  %322 = vmatpush.msra.mxu0 %v319_v37  ;;  %v238_v46 = vld [vmem:[%s1203_s6 + $0xe8] sm:$0xff]  ;;  %v311_v51 = vld [vmem:[%s1558_s1 + $0x30] sm:$0xff]  ;;  %v309_v56 = vld [vmem:[%s1558_s1 + $0x20] sm:$0xff] }
  0x36   : > { %789 = vmatpush.msra.mxu2 %v319_v37  ;;  %788 = vmatpush.msra.mxu1 %v319_v37  ;;  %v314_v47 = vld [vmem:[%s1558_s1 + $0x48] sm:$0xff]  ;;  %v907_v48 = vpack.i.bf16 %v238_v46, %v222_v45  ;;  %v223_v52 = vld [vmem:[%s1203_s6 + $0x70] sm:$0xff]  ;;  %v308_v57 = vld [vmem:[%s1558_s1 + $0x18] sm:$0xff]  ;;  %p1047_p7 = pnand %p1046_p4, %p1042_p0 }
  0x37   : > { %790 = vmatpush.msra.mxu3 %v319_v37  ;;  %323 = vmatpush.msra.mxu0 %v318_v40  ;;  %v239_v53 = vld [vmem:[%s1203_s6 + $0xf0] sm:$0xff]  ;;  %v310_v54 = vld [vmem:[%s1558_s1 + $0x28] sm:$0xff]  ;;  %v224_v59 = vld [vmem:[%s1203_s6 + $0x78] sm:$0xff] }
  0x38   : > { %792 = vmatpush.msra.mxu2 %v318_v40  ;;  %791 = vmatpush.msra.mxu1 %v318_v40  ;;  %v909_v55 = vpack.i.bf16 %v239_v53, %v223_v52  ;;  %v307_v58 = vld [vmem:[%s1558_s1 + $0x10] sm:$0xff]  ;;  %v240_v60 = vld [vmem:[%s1203_s6 + $0xf8] sm:$0xff]  ;;  %v306_v61 = vld [vmem:[%s1558_s1 + $0x8] sm:$0xff] }
  0x39   : > { %793 = vmatpush.msra.mxu3 %v318_v40  ;;  %324 = vmatpush.msra.mxu0 %v317_v42  ;;  %v911_v62 = vpack.i.bf16 %v240_v60, %v224_v59  ;;  %v305_v63 = vld [vmem:[%s1558_s1] sm:$0xff] }
  0x3a   : > { %795 = vmatpush.msra.mxu2 %v317_v42  ;;  %794 = vmatpush.msra.mxu1 %v317_v42 }
  0x3b   : > { %325 = vmatpush.msra.mxu0 %v316_v43  ;;  %796 = vmatpush.msra.mxu3 %v317_v42 }
  0x3c   : > { %798 = vmatpush.msra.mxu2 %v316_v43  ;;  %797 = vmatpush.msra.mxu1 %v316_v43 }
  0x3d   : > { %886 = vxpose.xlu0.b32.cont [3/16] %v885_v8, 128  ;;  %326 = vmatpush.msra.mxu0 %v315_v44 }
  0x3e   : > { %801 = vmatpush.msra.mxu2 %v315_v44  ;;  %799 = vmatpush.msra.mxu3 %v316_v43 }
  0x3f   : > { %800 = vmatpush.msra.mxu1 %v315_v44  ;;  %327 = vmatpush.msra.mxu0 %v314_v47 }
  0x40   : > { %804 = vmatpush.msra.mxu2 %v314_v47  ;;  %802 = vmatpush.msra.mxu3 %v315_v44 }
  0x41   : > { %803 = vmatpush.msra.mxu1 %v314_v47  ;;  %328 = vmatpush.msra.mxu0 %v313_v49 }
  0x42   : > { %807 = vmatpush.msra.mxu2 %v313_v49  ;;  %805 = vmatpush.msra.mxu3 %v314_v47 }
  0x43   : > { %329 = vmatpush.msra.mxu0 %v312_v50  ;;  %806 = vmatpush.msra.mxu1 %v313_v49 }
  0x44   : > { %810 = vmatpush.msra.mxu2 %v312_v50  ;;  %808 = vmatpush.msra.mxu3 %v313_v49 }
  0x45   : > { %888 = vxpose.xlu0.b32.cont [4/16] %v887_v11, 128  ;;  %330 = vmatpush.msra.mxu0 %v311_v51 }
  0x46   : > { %813 = vmatpush.msra.mxu2 %v311_v51  ;;  %809 = vmatpush.msra.mxu1 %v312_v50 }
  0x47   : > { %811 = vmatpush.msra.mxu3 %v312_v50  ;;  %331 = vmatpush.msra.mxu0 %v310_v54 }
  0x48   : > { %816 = vmatpush.msra.mxu2 %v310_v54  ;;  %812 = vmatpush.msra.mxu1 %v311_v51 }
  0x49   : > { %814 = vmatpush.msra.mxu3 %v311_v51  ;;  %332 = vmatpush.msra.mxu0 %v309_v56 }
  0x4a   : > { %819 = vmatpush.msra.mxu2 %v309_v56  ;;  %815 = vmatpush.msra.mxu1 %v310_v54 }
  0x4b   : > { %333 = vmatpush.msra.mxu0 %v308_v57  ;;  %817 = vmatpush.msra.mxu3 %v310_v54 }
  0x4c   : > { %822 = vmatpush.msra.mxu2 %v308_v57  ;;  %818 = vmatpush.msra.mxu1 %v309_v56 }
  0x4d   : > { %890 = vxpose.xlu0.b32.cont [5/16] %v889_v14, 128  ;;  %334 = vmatpush.msra.mxu0 %v307_v58 }
  0x4e   : > { %825 = vmatpush.msra.mxu2 %v307_v58  ;;  %820 = vmatpush.msra.mxu3 %v309_v56 }
  0x4f   : > { %821 = vmatpush.msra.mxu1 %v308_v57  ;;  %335 = vmatpush.msra.mxu0 %v306_v61 }
  0x50   : > { %828 = vmatpush.msra.mxu2 %v306_v61  ;;  %823 = vmatpush.msra.mxu3 %v308_v57 }
  0x51   : > { %824 = vmatpush.msra.mxu1 %v307_v58  ;;  %336 = vmatpush.msra.mxu0 %v305_v63 }
  0x52   : > { %826 = vmatpush.msra.mxu3 %v307_v58  ;;  %831 = vmatpush.msra.mxu2 %v305_v63 }
  0x53   : > { %827 = vmatpush.msra.mxu1 %v306_v61 }
  0x54   : > { %829 = vmatpush.msra.mxu3 %v306_v61 }
  0x55   : > { %892 = vxpose.xlu0.b32.cont [6/16] %v891_v17, 128  ;;  %830 = vmatpush.msra.mxu1 %v305_v63 }
  0x56   : > { %832 = vmatpush.msra.mxu3 %v305_v63 }
  0x5d   : > { %894 = vxpose.xlu0.b32.cont [7/16] %v893_v20, 128 }
  0x65   : > { %896 = vxpose.xlu0.b32.cont [8/16] %v895_v23, 128 }
  0x6d   : > { %898 = vxpose.xlu0.b32.cont [9/16] %v897_v26, 128 }
  0x75   : > { %900 = vxpose.xlu0.b32.cont [10/16] %v899_v29, 128 }
  0x7d   : > { %902 = vxpose.xlu0.b32.cont [11/16] %v901_v32, 128 }
  0x85   : > { %904 = vxpose.xlu0.b32.cont [12/16] %v903_v35, 128 }
  0x8d   : > { %906 = vxpose.xlu0.b32.cont [13/16] %v905_v41, 128 }
  0x95   : > { %908 = vxpose.xlu0.b32.cont [14/16] %v907_v48, 128 }
  0x9d   : > { %910 = vxpose.xlu0.b32.cont [15/16] %v909_v55, 128 }
  0xa5   : > { %912 = vxpose.xlu0.b32.end [16/16] %v911_v62, 128 }
  0xd1   : > { %v913_v0 = vpop.trf.xlu0 }
  0xd2   : > { %v914_v1 = vunpack.i.l.bf16 %v913_v0  ;;  %v917_v2 = vunpack.i.h.bf16 %v913_v0 }
  0xd4   : > { %337 = vmatmul.f32.vlgmr.msra.gmra.mxu0 %v914_v1  ;;  %385 = vmatmul.f32.vlgmr.msra.gmra.mxu2 %v917_v2 }
  0xd9   : > { %v918_v3 = vpop.trf.xlu0 }
  0xda   : > { %v919_v4 = vunpack.i.l.bf16 %v918_v3  ;;  %v922_v5 = vunpack.i.h.bf16 %v918_v3 }
  0xdc   : > { %340 = vmatmul.f32.gmra.mxu0 %v919_v4  ;;  %388 = vmatmul.f32.gmra.mxu2 %v922_v5 }
  0xe1   : > { %v923_v6 = vpop.trf.xlu0 }
  0xe2   : > { %v924_v7 = vunpack.i.l.bf16 %v923_v6  ;;  %v927_v8 = vunpack.i.h.bf16 %v923_v6 }
  0xe4   : > { %343 = vmatmul.f32.gmra.mxu0 %v924_v7  ;;  %391 = vmatmul.f32.gmra.mxu2 %v927_v8 }
  0xe9   : > { %v928_v9 = vpop.trf.xlu0 }
  0xea   : > { %v929_v10 = vunpack.i.l.bf16 %v928_v9  ;;  %v932_v11 = vunpack.i.h.bf16 %v928_v9 }
  0xec   : > { %346 = vmatmul.f32.gmra.mxu0 %v929_v10  ;;  %394 = vmatmul.f32.gmra.mxu2 %v932_v11 }
  0xf1   : > { %v933_v12 = vpop.trf.xlu0 }
  0xf2   : > { %v934_v13 = vunpack.i.l.bf16 %v933_v12  ;;  %v937_v14 = vunpack.i.h.bf16 %v933_v12 }
  0xf4   : > { %349 = vmatmul.f32.gmra.mxu0 %v934_v13  ;;  %397 = vmatmul.f32.gmra.mxu2 %v937_v14 }
  0xf9   : > { %v938_v15 = vpop.trf.xlu0 }
  0xfa   : > { %v939_v16 = vunpack.i.l.bf16 %v938_v15  ;;  %v942_v17 = vunpack.i.h.bf16 %v938_v15 }
  0xfc   : > { %352 = vmatmul.f32.gmra.mxu0 %v939_v16  ;;  %400 = vmatmul.f32.gmra.mxu2 %v942_v17 }
 0x101   : > { %v943_v18 = vpop.trf.xlu0 }
 0x102   : > { %v944_v19 = vunpack.i.l.bf16 %v943_v18  ;;  %v947_v20 = vunpack.i.h.bf16 %v943_v18 }
 0x104   : > { %355 = vmatmul.f32.gmra.mxu0 %v944_v19  ;;  %403 = vmatmul.f32.gmra.mxu2 %v947_v20 }
 0x109   : > { %v948_v21 = vpop.trf.xlu0 }
 0x10a   : > { %v949_v22 = vunpack.i.l.bf16 %v948_v21  ;;  %v952_v23 = vunpack.i.h.bf16 %v948_v21 }
 0x10c   : > { %358 = vmatmul.f32.gmra.mxu0 %v949_v22  ;;  %406 = vmatmul.f32.gmra.mxu2 %v952_v23 }
 0x111   : > { %v953_v24 = vpop.trf.xlu0 }
 0x112   : > { %v954_v25 = vunpack.i.l.bf16 %v953_v24  ;;  %v957_v26 = vunpack.i.h.bf16 %v953_v24 }
 0x114   : > { %361 = vmatmul.f32.vlgmr.msra.gmra.mxu1 %v954_v25  ;;  %409 = vmatmul.f32.vlgmr.msra.gmra.mxu3 %v957_v26 }
 0x119   : > { %v958_v27 = vpop.trf.xlu0 }
 0x11a   : > { %v959_v28 = vunpack.i.l.bf16 %v958_v27  ;;  %v962_v29 = vunpack.i.h.bf16 %v958_v27 }
 0x11c   : > { %364 = vmatmul.f32.gmra.mxu1 %v959_v28  ;;  %412 = vmatmul.f32.gmra.mxu3 %v962_v29 }
 0x121   : > { %v963_v30 = vpop.trf.xlu0 }
 0x122   : > { %v964_v31 = vunpack.i.l.bf16 %v963_v30  ;;  %v967_v32 = vunpack.i.h.bf16 %v963_v30 }
 0x124   : > { %367 = vmatmul.f32.gmra.mxu1 %v964_v31  ;;  %415 = vmatmul.f32.gmra.mxu3 %v967_v32 }
 0x129   : > { %v968_v33 = vpop.trf.xlu0 }
 0x12a   : > { %v969_v34 = vunpack.i.l.bf16 %v968_v33  ;;  %v972_v35 = vunpack.i.h.bf16 %v968_v33 }
 0x12c   : > { %370 = vmatmul.f32.gmra.mxu1 %v969_v34  ;;  %418 = vmatmul.f32.gmra.mxu3 %v972_v35 }
 0x131   : > { %v973_v36 = vpop.trf.xlu0 }
 0x132   : > { %v974_v37 = vunpack.i.l.bf16 %v973_v36  ;;  %v977_v38 = vunpack.i.h.bf16 %v973_v36 }
 0x134   : > { %373 = vmatmul.f32.gmra.mxu1 %v974_v37  ;;  %421 = vmatmul.f32.gmra.mxu3 %v977_v38 }
 0x139   : > { %v978_v39 = vpop.trf.xlu0 }
 0x13a   : > { %v979_v40 = vunpack.i.l.bf16 %v978_v39  ;;  %v982_v41 = vunpack.i.h.bf16 %v978_v39 }
 0x13c   : > { %376 = vmatmul.f32.gmra.mxu1 %v979_v40  ;;  %424 = vmatmul.f32.gmra.mxu3 %v982_v41 }
 0x141   : > { %v983_v42 = vpop.trf.xlu0 }
 0x142   : > { %v984_v43 = vunpack.i.l.bf16 %v983_v42  ;;  %v987_v44 = vunpack.i.h.bf16 %v983_v42 }
 0x144   : > { %379 = vmatmul.f32.gmra.mxu1 %v984_v43  ;;  %427 = vmatmul.f32.gmra.mxu3 %v987_v44 }
 0x149   : > { %v988_v45 = vpop.trf.xlu0 }
 0x14a   : > { %v989_v46 = vunpack.i.l.bf16 %v988_v45  ;;  %v992_v47 = vunpack.i.h.bf16 %v988_v45 }
 0x14c   : > { %382 = vmatmul.f32.gmra.mxu1 %v989_v46  ;;  %430 = vmatmul.f32.gmra.mxu3 %v992_v47 }
 0x151   : > { %v338_v48 = vpop.f32.mrf.mxu0 }
 0x152   : > { %435 = vst.msk [vmem:[%s1297_s9] sm:$0xff] %vm434_vm0, %v338_v48  ;;  %v536_v50 = vmul.f32 %v338_v48, %v338_v48  ;;  %v467_v52 = vsel %vm434_vm0, %v338_v48, 0.0 }
 0x154   : > { %v568_v56 = vsel %vm434_vm0, %v536_v50, 0.0 }
 0x157   : > { %v1301_v49 = vpop.f32.mrf.mxu2 }
 0x158   : > { %451 = vst.msk [vmem:[%s1297_s9 + $0x80] sm:$0xff] %vm434_vm0, %v1301_v49 }
 0x159   : > { %v341_v51 = vpop.f32.mrf.mxu0 }
 0x15a   : > { %436 = vst.msk [vmem:[%s1297_s9 + $0x8] sm:$0xff] %vm434_vm0, %v341_v51  ;;  %v468_v53 = vsel %vm434_vm0, %v341_v51, 0.0  ;;  %v537_v54 = vmul.f32 %v341_v51, %v341_v51 }
 0x15b   : > { %v469_v55 = vadd.f32 %v468_v53, %v467_v52 }
 0x15c   : > { %v569_v57 = vsel %vm434_vm0, %v537_v54, 0.0 }
 0x15d   : > { %v570_v58 = vadd.f32 %v569_v57, %v568_v56 }
 0x15f   : > { %v1312_v59 = vpop.f32.mrf.mxu2 }
 0x160   : > { %452 = vst.msk [vmem:[%s1297_s9 + $0x88] sm:$0xff] %vm434_vm0, %v1312_v59 }
 0x161   : > { %v344_v60 = vpop.f32.mrf.mxu0 }
 0x162   : > { %437 = vst.msk [vmem:[%s1297_s9 + $0x10] sm:$0xff] %vm434_vm0, %v344_v60  ;;  %v470_v61 = vsel %vm434_vm0, %v344_v60, 0.0  ;;  %v538_v62 = vmul.f32 %v344_v60, %v344_v60 }
 0x163   : > { %v471_v63 = vadd.f32 %v470_v61, %v469_v55 }
 0x164   : > { %v571_v0 = vsel %vm434_vm0, %v538_v62, 0.0 }
 0x165   : > { %v572_v1 = vadd.f32 %v571_v0, %v570_v58 }
 0x167   : > { %v1321_v2 = vpop.f32.mrf.mxu2 }
 0x168   : > { %453 = vst.msk [vmem:[%s1297_s9 + $0x90] sm:$0xff] %vm434_vm0, %v1321_v2 }
 0x169   : > { %v347_v3 = vpop.f32.mrf.mxu0 }
 0x16a   : > { %438 = vst.msk [vmem:[%s1297_s9 + $0x18] sm:$0xff] %vm434_vm0, %v347_v3  ;;  %v472_v4 = vsel %vm434_vm0, %v347_v3, 0.0  ;;  %v539_v5 = vmul.f32 %v347_v3, %v347_v3 }
 0x16b   : > { %v473_v6 = vadd.f32 %v472_v4, %v471_v63 }
 0x16c   : > { %v573_v7 = vsel %vm434_vm0, %v539_v5, 0.0 }
 0x16d   : > { %v574_v8 = vadd.f32 %v573_v7, %v572_v1 }
 0x16f   : > { %v1330_v9 = vpop.f32.mrf.mxu2 }
 0x170   : > { %454 = vst.msk [vmem:[%s1297_s9 + $0x98] sm:$0xff] %vm434_vm0, %v1330_v9 }
 0x171   : > { %v350_v10 = vpop.f32.mrf.mxu0 }
 0x172   : > { %439 = vst.msk [vmem:[%s1297_s9 + $0x20] sm:$0xff] %vm434_vm0, %v350_v10  ;;  %v474_v11 = vsel %vm434_vm0, %v350_v10, 0.0  ;;  %v540_v12 = vmul.f32 %v350_v10, %v350_v10 }
 0x173   : > { %v475_v13 = vadd.f32 %v474_v11, %v473_v6 }
 0x174   : > { %v575_v14 = vsel %vm434_vm0, %v540_v12, 0.0 }
 0x175   : > { %v576_v15 = vadd.f32 %v575_v14, %v574_v8 }
 0x177   : > { %v1339_v16 = vpop.f32.mrf.mxu2 }
 0x178   : > { %455 = vst.msk [vmem:[%s1297_s9 + $0xa0] sm:$0xff] %vm434_vm0, %v1339_v16 }
 0x179   : > { %v353_v17 = vpop.f32.mrf.mxu0 }
 0x17a   : > { %440 = vst.msk [vmem:[%s1297_s9 + $0x28] sm:$0xff] %vm434_vm0, %v353_v17  ;;  %v541_v32 = vmul.f32 %v353_v17, %v353_v17  ;;  %v476_v33 = vsel %vm434_vm0, %v353_v17, 0.0 }
 0x17b   : > { %v477_v38 = vadd.f32 %v476_v33, %v475_v13 }
 0x17c   : > { %v577_v35 = vsel %vm434_vm0, %v541_v32, 0.0 }
 0x17d   : > { %v578_v43 = vadd.f32 %v577_v35, %v576_v15  ;;  %v552_v35 = vmul.f32 %v1301_v49, %v1301_v49 }
 0x17f   : > { %v1346_v18 = vpop.f32.mrf.mxu2 }
 0x180   : > { %456 = vst.msk [vmem:[%s1297_s9 + $0xa8] sm:$0xff] %vm434_vm0, %v1346_v18 }
 0x181   : > { %v356_v19 = vpop.f32.mrf.mxu0 }
 0x182   : > { %441 = vst.msk [vmem:[%s1297_s9 + $0x30] sm:$0xff] %vm434_vm0, %v356_v19  ;;  %v542_v34 = vmul.f32 %v356_v19, %v356_v19  ;;  %v478_v36 = vsel %vm434_vm0, %v356_v19, 0.0 }
 0x183   : > { %v479_v44 = vadd.f32 %v478_v36, %v477_v38 }
 0x184   : > { %v579_v40 = vsel %vm434_vm0, %v542_v34, 0.0 }
 0x185   : > { %v580_v50 = vadd.f32 %v579_v40, %v578_v43 }
 0x187   : > { %v1353_v20 = vpop.f32.mrf.mxu2 }
 0x188   : > { %457 = vst.msk [vmem:[%s1297_s9 + $0xb0] sm:$0xff] %vm434_vm0, %v1353_v20 }
 0x189   : > { %v359_v21 = vpop.f32.mrf.mxu0 }
 0x18a   : > { %442 = vst.msk [vmem:[%s1297_s9 + $0x38] sm:$0xff] %vm434_vm0, %v359_v21  ;;  %v543_v37 = vmul.f32 %v359_v21, %v359_v21  ;;  %v480_v41 = vsel %vm434_vm0, %v359_v21, 0.0 }
 0x18b   : > { %v481_v51 = vadd.f32 %v480_v41, %v479_v44  ;;  %v498_v41 = vsel %vm434_vm0, %v1301_v49, 0.0 }
 0x18c   : > { %v581_v46 = vsel %vm434_vm0, %v543_v37, 0.0 }
 0x18d   : > { %v582_v55 = vadd.f32 %v581_v46, %v580_v50  ;;  %v599_v46 = vsel %vm434_vm0, %v552_v35, 0.0 }
 0x18f   : > { %v1360_v22 = vpop.f32.mrf.mxu2 }
 0x190   : > { %458 = vst.msk [vmem:[%s1297_s9 + $0xb8] sm:$0xff] %vm434_vm0, %v1360_v22 }
 0x191   : > { %v362_v23 = vpop.f32.mrf.mxu1 }
 0x192   : > { %443 = vst.msk [vmem:[%s1297_s9 + $0x40] sm:$0xff] %vm434_vm0, %v362_v23  ;;  %v544_v42 = vmul.f32 %v362_v23, %v362_v23  ;;  %v482_v47 = vsel %vm434_vm0, %v362_v23, 0.0 }
 0x193   : > { %v483_v56 = vadd.f32 %v482_v47, %v481_v51  ;;  %v500_v47 = vsel %vm434_vm0, %v1312_v59, 0.0 }
 0x194   : > { %v583_v52 = vsel %vm434_vm0, %v544_v42, 0.0  ;;  %v553_v42 = vmul.f32 %v1312_v59, %v1312_v59 }
 0x195   : > { %v584_v61 = vadd.f32 %v583_v52, %v582_v55 }
 0x196   : > { %v601_v49 = vsel %vm434_vm0, %v553_v42, 0.0 }
 0x197   : > { %v1367_v24 = vpop.f32.mrf.mxu3 }
 0x198   : > { %459 = vst.msk [vmem:[%s1297_s9 + $0xc0] sm:$0xff] %vm434_vm0, %v1367_v24 }
 0x199   : > { %v365_v25 = vpop.f32.mrf.mxu1 }
 0x19a   : > { %444 = vst.msk [vmem:[%s1297_s9 + $0x48] sm:$0xff] %vm434_vm0, %v365_v25  ;;  %v545_v48 = vmul.f32 %v365_v25, %v365_v25  ;;  %v484_v53 = vsel %vm434_vm0, %v365_v25, 0.0 }
 0x19b   : > { %v485_v62 = vadd.f32 %v484_v53, %v483_v56  ;;  %v502_v53 = vsel %vm434_vm0, %v1321_v2, 0.0 }
 0x19c   : > { %v585_v57 = vsel %vm434_vm0, %v545_v48, 0.0  ;;  %v554_v48 = vmul.f32 %v1321_v2, %v1321_v2 }
 0x19d   : > { %v586_v4 = vadd.f32 %v585_v57, %v584_v61  ;;  %v504_v57 = vsel %vm434_vm0, %v1330_v9, 0.0 }
 0x19e   : > { %v603_v56 = vsel %vm434_vm0, %v554_v48, 0.0 }
 0x19f   : > { %v1374_v26 = vpop.f32.mrf.mxu3 }
 0x1a0   : > { %460 = vst.msk [vmem:[%s1297_s9 + $0xc8] sm:$0xff] %vm434_vm0, %v1374_v26 }
 0x1a1   : > { %v368_v27 = vpop.f32.mrf.mxu1 }
 0x1a2   : > { %445 = vst.msk [vmem:[%s1297_s9 + $0x50] sm:$0xff] %vm434_vm0, %v368_v27  ;;  %v546_v54 = vmul.f32 %v368_v27, %v368_v27  ;;  %v486_v58 = vsel %vm434_vm0, %v368_v27, 0.0 }
 0x1a3   : > { %v487_v5 = vadd.f32 %v486_v58, %v485_v62  ;;  %v556_v58 = vmul.f32 %v1339_v16, %v1339_v16  ;;  %v506_v62 = vsel %vm434_vm0, %v1339_v16, 0.0  ;;  %v510_v16 = vsel %vm434_vm0, %v1353_v20, 0.0 }
 0x1a4   : > { %v587_v0 = vsel %vm434_vm0, %v546_v54, 0.0  ;;  %v555_v54 = vmul.f32 %v1330_v9, %v1330_v9  ;;  %v508_v9 = vsel %vm434_vm0, %v1346_v18, 0.0 }
 0x1a5   : > { %v588_v11 = vadd.f32 %v587_v0, %v586_v4  ;;  %v557_v0 = vmul.f32 %v1346_v18, %v1346_v18  ;;  %v607_v4 = vsel %vm434_vm0, %v556_v58, 0.0  ;;  %v512_v18 = vsel %vm434_vm0, %v1360_v22, 0.0 }
 0x1a6   : > { %v605_v2 = vsel %vm434_vm0, %v555_v54, 0.0 }
 0x1a7   : > { %v1381_v28 = vpop.f32.mrf.mxu3 }
 0x1a8   : > { %461 = vst.msk [vmem:[%s1297_s9 + $0xd0] sm:$0xff] %vm434_vm0, %v1381_v28 }
 0x1a9   : > { %v371_v29 = vpop.f32.mrf.mxu1 }
 0x1aa   : > { %446 = vst.msk [vmem:[%s1297_s9 + $0x58] sm:$0xff] %vm434_vm0, %v371_v29  ;;  %v547_v60 = vmul.f32 %v371_v29, %v371_v29  ;;  %v488_v1 = vsel %vm434_vm0, %v371_v29, 0.0 }
 0x1ab   : > { %v489_v12 = vadd.f32 %v488_v1, %v487_v5  ;;  %v558_v5 = vmul.f32 %v1353_v20, %v1353_v20  ;;  %v514_v20 = vsel %vm434_vm0, %v1367_v24, 0.0 }
 0x1ac   : > { %v589_v7 = vsel %vm434_vm0, %v547_v60, 0.0 }
 0x1ad   : > { %v590_v17 = vadd.f32 %v589_v7, %v588_v11 }
 0x1af   : > { %v1388_v30 = vpop.f32.mrf.mxu3 }
 0x1b0   : > { %462 = vst.msk [vmem:[%s1297_s9 + $0xd8] sm:$0xff] %vm434_vm0, %v1388_v30  ;;  %v563_v35 = vmul.f32 %v1388_v30, %v1388_v30 }
 0x1b1   : > { %v374_v31 = vpop.f32.mrf.mxu1 }
 0x1b2   : > { %447 = vst.msk [vmem:[%s1297_s9 + $0x60] sm:$0xff] %vm434_vm0, %v374_v31  ;;  %v548_v3 = vmul.f32 %v374_v31, %v374_v31  ;;  %v490_v8 = vsel %vm434_vm0, %v374_v31, 0.0 }
 0x1b3   : > { %v491_v19 = vadd.f32 %v490_v8, %v489_v12  ;;  %v609_v8 = vsel %vm434_vm0, %v557_v0, 0.0 }
 0x1b4   : > { %v591_v13 = vsel %vm434_vm0, %v548_v3, 0.0 }
 0x1b5   : > { %v592_v25 = vadd.f32 %v591_v13, %v590_v17  ;;  %v611_v13 = vsel %vm434_vm0, %v558_v5, 0.0 }
 0x1b7   : > { %v1398_v39 = vpop.f32.mrf.mxu3 }
 0x1b8   : > { %463 = vst.msk [vmem:[%s1297_s9 + $0xe0] sm:$0xff] %vm434_vm0, %v1398_v39 }
 0x1b9   : > { %v377_v45 = vpop.f32.mrf.mxu1 }
 0x1ba   : > { %448 = vst.msk [vmem:[%s1297_s9 + $0x68] sm:$0xff] %vm434_vm0, %v377_v45  ;;  %v549_v10 = vmul.f32 %v377_v45, %v377_v45  ;;  %v492_v14 = vsel %vm434_vm0, %v377_v45, 0.0 }
 0x1bb   : > { %v493_v27 = vadd.f32 %v492_v14, %v491_v19  ;;  %v560_v14 = vmul.f32 %v1367_v24, %v1367_v24  ;;  %v518_v24 = vsel %vm434_vm0, %v1381_v28, 0.0 }
 0x1bc   : > { %v593_v21 = vsel %vm434_vm0, %v549_v10, 0.0  ;;  %v559_v10 = vmul.f32 %v1360_v22, %v1360_v22  ;;  %v516_v22 = vsel %vm434_vm0, %v1374_v26, 0.0 }
 0x1bd   : > { %v594_v32 = vadd.f32 %v593_v21, %v592_v25  ;;  %v561_v21 = vmul.f32 %v1374_v26, %v1374_v26  ;;  %v520_v26 = vsel %vm434_vm0, %v1388_v30, 0.0 }
 0x1be   : > { %v613_v19 = vsel %vm434_vm0, %v559_v10, 0.0 }
 0x1bf   : > { %v1413_v63 = vpop.f32.mrf.mxu3 }
 0x1c0   : > { %464 = vst.msk [vmem:[%s1297_s9 + $0xe8] sm:$0xff] %vm434_vm0, %v1413_v63  ;;  %v524_v30 = vsel %vm434_vm0, %v1413_v63, 0.0 }
 0x1c1   : > { %v380_v6 = vpop.f32.mrf.mxu1 }
 0x1c2   : > { %449 = vst.msk [vmem:[%s1297_s9 + $0x70] sm:$0xff] %vm434_vm0, %v380_v6  ;;  %v550_v15 = vmul.f32 %v380_v6, %v380_v6  ;;  %v494_v23 = vsel %vm434_vm0, %v380_v6, 0.0 }
 0x1c3   : > { %v495_v33 = vadd.f32 %v494_v23, %v493_v27  ;;  %v615_v27 = vsel %vm434_vm0, %v560_v14, 0.0 }
 0x1c4   : > { %v595_v31 = vsel %vm434_vm0, %v550_v15, 0.0 }
 0x1c5   : > { %v596_v38 = vadd.f32 %v595_v31, %v594_v32  ;;  %v562_v31 = vmul.f32 %v1381_v28, %v1381_v28  ;;  %v522_v28 = vsel %vm434_vm0, %v1398_v39, 0.0 }
 0x1c7   : > { %v1428_v29 = vpop.f32.mrf.mxu3 }
 0x1c8   : > { %465 = vst.msk [vmem:[%s1297_s9 + $0xf0] sm:$0xff] %vm434_vm0, %v1428_v29  ;;  %v566_v48 = vmul.f32 %v1428_v29, %v1428_v29 }
 0x1c9   : > { %v383_v34 = vpop.f32.mrf.mxu1 }
 0x1ca   : > { %450 = vst.msk [vmem:[%s1297_s9 + $0x78] sm:$0xff] %vm434_vm0, %v383_v34  ;;  %v496_v36 = vsel %vm434_vm0, %v383_v34, 0.0  ;;  %v551_v37 = vmul.f32 %v383_v34, %v383_v34  ;;  %v617_v34 = vsel %vm434_vm0, %v561_v21, 0.0 }
 0x1cb   : > { %v497_v40 = vadd.f32 %v496_v36, %v495_v33 }
 0x1cc   : > { %v597_v43 = vsel %vm434_vm0, %v551_v37, 0.0 }
 0x1cd   : > { %v499_v44 = vadd.f32 %v498_v41, %v497_v40  ;;  %v598_v45 = vadd.f32 %v597_v43, %v596_v38  ;;  %v619_v38 = vsel %vm434_vm0, %v562_v31, 0.0  ;;  %v564_v40 = vmul.f32 %v1398_v39, %v1398_v39 }
 0x1ce   : > { %v621_v43 = vsel %vm434_vm0, %v563_v35, 0.0  ;;  %v526_v39 = vsel %vm434_vm0, %v1428_v29, 0.0 }
 0x1cf   : > { %v501_v50 = vadd.f32 %v500_v47, %v499_v44  ;;  %v600_v51 = vadd.f32 %v599_v46, %v598_v45  ;;  %v1449_v52 = vpop.f32.mrf.mxu3  ;;  %v565_v44 = vmul.f32 %v1413_v63, %v1413_v63  ;;  %v623_v47 = vsel %vm434_vm0, %v564_v40, 0.0 }
 0x1d0   : > { %466 = vst.msk [vmem:[%s1297_s9 + $0xf8] sm:$0xff] %vm434_vm0, %v1449_v52  ;;  %v528_v63 = vsel %vm434_vm0, %v1449_v52, 0.0 }
 0x1d1   : > { %v503_v55 = vadd.f32 %v502_v53, %v501_v50  ;;  %v602_v59 = vadd.f32 %v601_v49, %v600_v51  ;;  %v625_v49 = vsel %vm434_vm0, %v565_v44, 0.0  ;;  %v567_v53 = vmul.f32 %v1449_v52, %v1449_v52 }
 0x1d3   : > { %v505_v60 = vadd.f32 %v504_v57, %v503_v55  ;;  %v604_v61 = vadd.f32 %v603_v56, %v602_v59  ;;  %v627_v59 = vsel %vm434_vm0, %v566_v48, 0.0  ;;  %v629_v58 = vsel %vm434_vm0, %v567_v53, 0.0 }
 0x1d5   : > { %v507_v1 = vadd.f32 %v506_v62, %v505_v60  ;;  %v606_v3 = vadd.f32 %v605_v2, %v604_v61  ;;  %v637_v62 = vlaneseq }
 0x1d7   : > { %v509_v6 = vadd.f32 %v508_v9, %v507_v1  ;;  %v608_v7 = vadd.f32 %v607_v4, %v606_v3  ;;  %v638_v9 = vshrl.u32 %v637_v62, 7 }
 0x1d9   : > { %v511_v11 = vadd.f32 %v510_v16, %v509_v6  ;;  %v610_v12 = vadd.f32 %v609_v8, %v608_v7  ;;  %vm639_vm1 = vcmp.eq.s32.totalorder %v638_v9, 0 }
 0x1db   : > { %v612_v15 = vadd.f32 %v611_v13, %v610_v12  ;;  %v513_v17 = vadd.f32 %v512_v18, %v511_v11 }
 0x1dd   : > { %v515_v23 = vadd.f32 %v514_v20, %v513_v17  ;;  %v614_v25 = vadd.f32 %v613_v19, %v612_v15 }
 0x1df   : > { %v517_v32 = vadd.f32 %v516_v22, %v515_v23  ;;  %v616_v33 = vadd.f32 %v615_v27, %v614_v25 }
 0x1e1   : > { %v519_v36 = vadd.f32 %v518_v24, %v517_v32  ;;  %v618_v37 = vadd.f32 %v617_v34, %v616_v33 }
 0x1e3   : > { %v521_v41 = vadd.f32 %v520_v26, %v519_v36  ;;  %v620_v42 = vadd.f32 %v619_v38, %v618_v37 }
 0x1e5   : > { %v523_v45 = vadd.f32 %v522_v28, %v521_v41  ;;  %v622_v46 = vadd.f32 %v621_v43, %v620_v42 }
 0x1e7   : > { %v525_v50 = vadd.f32 %v524_v30, %v523_v45  ;;  %v624_v51 = vadd.f32 %v623_v47, %v622_v46 }
 0x1e9   : > { %v527_v54 = vadd.f32 %v526_v39, %v525_v50  ;;  %v626_v55 = vadd.f32 %v625_v49, %v624_v51 }
 0x1eb   : > { %v529_v56 = vadd.f32 %v528_v63, %v527_v54  ;;  %v628_v57 = vadd.f32 %v627_v59, %v626_v55 }
 0x1ed   : > { %v530_v60 = vrot.slane %v529_v56, 4  ;;  %v630_v61 = vadd.f32 %v629_v58, %v628_v57 }
 0x1ef   : > { %v531_v2 = vadd.f32 %v530_v60, %v529_v56  ;;  %v631_v29 = vrot.slane %v630_v61, 4 }
 0x1f1   : > { %v532_v0 = vrot.slane %v531_v2, 2  ;;  %v632_v1 = vadd.f32 %v631_v29, %v630_v61 }
 0x1f3   : > { %v533_v3 = vadd.f32 %v532_v0, %v531_v2  ;;  %v633_v4 = vrot.slane %v632_v1, 2 }
 0x1f5   : > { %v534_v52 = vrot.slane %v533_v3, 1  ;;  %v634_v5 = vadd.f32 %v633_v4, %v632_v1 }
 0x1f7   : > { %v635_v6 = vrot.slane %v634_v5, 1  ;;  %v535_v7 = vadd.f32 %v534_v52, %v533_v3 }
 0x1f9   : > { %v636_v8 = vadd.f32 %v635_v6, %v634_v5 }
 0x1fb   : > { %v640_v16 = vsel %vm639_vm1, %v535_v7, %v636_v8 }
 0x1fc   : > { %642 = vst.msk [vmem:[%s200_s19] sm:$0x3] %vm641_vm2, %v640_v16 }
 0x1fd   : > { %1050 = shalt.err (!%p1047_p7)
}
 0x1fe   : > { %835 = dma.vmem_to_hbm [thread:$0]  (%p1163_p11), %s667_s20, 32, %s669_s22, %s650_s27  }
 0x1ff PF: > { %s689_s29 = sand.u32 1, %s1077_s12   ;;  %p1566_p5 = scmp.ge.s32.totalorder %s1089_s15, 2 }
 0x200   : > { %s690_s7 = scalar_lea.sflag [#allocation4], %s689_s29 }
 0x201   : > { %p842_p8 = pnand %p1566_p5, %p1167_p12 }
 0x203   : > { %p843_p10 = pneg %p842_p8 }
 0x205   : > { %1072 = dma.done.wait (%p843_p10), %s690_s7, 32  }
 0x206   : > { %1074 = vsyncadd (%p843_p10), %s690_s7, 4294967264  ;;  %p17_p2 = scmp.ge.s32.totalorder %s1138_s18, 4   ;;  %s1567_s12 = smov %s1081_s13 }
 0x207   : > { %s1568_s13 = smov %s1085_s14  ;;  %s1569_s14 = smov %s1150_s21 }
 0x208   : > { %s1570_s15 = smov %s1138_s18  ;;  %19 = sbr.rel (!%p17_p2) target bundleno = 5 (0x5), region = 85 }
 0x20d   :  { %696 = vsyncpa [#allocation3], 1 }
 0x20e   :  { %698 = vsyncpa [#allocation3 + $0x1], 1 }
 0x20f   :  { %699 = vsyncpa [#allocation4], 1 }
 0x210   :  { %701 = vsyncpa [#allocation4 + $0x1], 1 }

</bundles_post_ra>
